<compile_context>
chip_gen: v7x
topology: tpu7x:2x2x1
jax: 0.10.0
libtpu: 0.0.40
codegen_flags: <defaults>
</compile_context>

<pallas_src>
import functools

import numpy as np
import jax
import jax.numpy as jnp
from jax.experimental import pallas as pl
from jax.experimental.pallas import tpu as pltpu

EPS = 1e-5


def _round_up(x, m):
    return (x + m - 1) // m * m


def _double_conv_kernel(x_ref, w1_ref, s1_ref, w2_ref, s2_ref, mask_ref, o_ref,
                        *, taps, lanes):
    """Fused (conv3x3 + BN-shift + ReLU) x2 on one lane-dense (C, L) block.

    x_ref:    (Cin_p, L)        channel-major input, L = images_per_step * H*W
    w1_ref:   (C1_p, KK*Cin_p)  BN-scale-folded slab weights (tap-major columns)
    s1_ref:   (C1_p, 1)         BN shift
    w2_ref:   (Cout2, KK*C1_p)
    s2_ref:   (Cout2, 1)
    mask_ref: (KK, 1, L)        per-tap validity mask (border/wrap -> 0)
    o_ref:    (Cout2, L)        lane-dense output block
    """

    def conv_bn_relu(val, w_ref, s_ref):
        pieces = []
        for t, delta in enumerate(taps):
            if delta == 0:
                # Center tap: always in-bounds, mask is all ones -> skip roll + multiply.
                pieces.append(val)
            else:
                shifted = pltpu.roll(val, shift=(-delta) % lanes, axis=1)
                pieces.append(shifted * mask_ref[t])
        slab = jnp.concatenate(pieces, axis=0)                       # (KK*C, L)
        y = jnp.dot(w_ref[...], slab, preferred_element_type=jnp.float32)
        return jnp.maximum(y + s_ref[...], 0.0)

    h = conv_bn_relu(x_ref[...], w1_ref, s1_ref)                     # (C1_p, L), in registers
    o_ref[...] = conv_bn_relu(h, w2_ref, s2_ref).astype(o_ref.dtype)


def _fold_bn_to_slab(w_oihw, gamma, beta, rmean, rvar, *, cin_pad, cout_pad):
    """Fold BN(inference) scale into conv weights; return slab weights + shift.

    Slab column ordering matches the kernel's concatenated pieces: col = t*cin_pad + c,
    with tap index t = kh*KW + kw.  Channel dims are zero-padded to (cout_pad, cin_pad).
    """
    cout, cin, kh, kw = w_oihw.shape
    inv_std = 1.0 / jnp.sqrt(rvar + EPS)
    scale = gamma * inv_std                                          # (Cout,)
    shift = beta - rmean * scale                                     # (Cout,)
    w_scaled = w_oihw * scale[:, None, None, None]                   # (Cout, Cin, KH, KW)
    w_scaled = jnp.pad(w_scaled,
                       ((0, cout_pad - cout), (0, cin_pad - cin), (0, 0), (0, 0)))
    shift = jnp.pad(shift, (0, cout_pad - cout))
    w_slab = jnp.transpose(w_scaled, (0, 2, 3, 1)).reshape(cout_pad, kh * kw * cin_pad)
    return w_slab.astype(jnp.float32), shift.reshape(cout_pad, 1).astype(jnp.float32)


def _tap_offsets_and_masks(H, W, KH, KW, pad):
    """Static flattened-lane offset and validity mask per kernel tap (kh, kw)."""
    ii = np.repeat(np.arange(H), W)   # row index of each flattened output position
    jj = np.tile(np.arange(W), H)     # col index
    taps, masks = [], []
    for kh in range(KH):
        for kw in range(KW):
            di, dj = kh - pad, kw - pad
            taps.append(di * W + dj)
            valid = (ii + di >= 0) & (ii + di < H) & (jj + dj >= 0) & (jj + dj < W)
            masks.append(valid.astype(np.float32))
    mask_arr = np.stack(masks).reshape(KH * KW, 1, H * W)
    return tuple(int(t) for t in taps), mask_arr


def _pick_images_per_step(N, S, max_lanes=8192):
    """Largest divisor of N whose lane width stays modest (VMEM is tiny either way)."""
    nb = 1
    for cand in range(1, N + 1):
        if N % cand == 0 and cand * S <= max_lanes:
            nb = cand
    return nb


def double_conv2d_relu(x_nchw, params, *, padding):
    """Fused DoubleConv2DReLU forward. x_nchw: (N, Cin, H, W) -> (N, Cout, H, W)."""
    N, Cin, H, W = x_nchw.shape
    p0, p1 = params["block0"], params["block1"]
    Cout1, _, KH, KW = p0["w"].shape
    Cout2 = p1["w"].shape[0]

    # Roll+mask formulation assumes the module's stride=1 'same' configuration.
    assert 2 * padding == KH - 1 == KW - 1, "fused kernel assumes stride=1 'same' conv"
    # TODO(synk): general stride / non-'same' padding needs a different shift formulation.

    S = H * W
    KK = KH * KW
    Cin_p = _round_up(Cin, 8)        # pad contraction channels so concat pieces are tile-aligned
    C1_p = _round_up(Cout1, 8)

    taps, mask_np = _tap_offsets_and_masks(H, W, KH, KW, padding)

    Nb = _pick_images_per_step(N, S)  # images per grid step (batch folded into lanes)
    G = N // Nb
    L = Nb * S

    # Per-tap masks also kill cross-image contamination of the circular roll on the
    # concatenated lane axis, because any tap whose source leaves its own image is a
    # border tap (mask 0).
    masks = jnp.asarray(np.tile(mask_np, (1, 1, Nb)))                # (KK, 1, L)

    w1, s1 = _fold_bn_to_slab(p0["w"], p0["gamma"], p0["beta"], p0["rmean"], p0["rvar"],
                              cin_pad=Cin_p, cout_pad=C1_p)
    w2, s2 = _fold_bn_to_slab(p1["w"], p1["gamma"], p1["beta"], p1["rmean"], p1["rvar"],
                              cin_pad=C1_p, cout_pad=Cout2)

    # Channel-major with batch folded into lanes: x_cm[c, n*S + s] = x[n, c, s].
    x_cm = jnp.transpose(x_nchw.reshape(N, Cin, S), (1, 0, 2)).reshape(Cin, N * S)
    x_cm = jnp.pad(x_cm, ((0, Cin_p - Cin), (0, 0)))                 # tiny sublane pad

    kernel = functools.partial(_double_conv_kernel, taps=taps, lanes=L)

    out = pl.pallas_call(
        kernel,
        out_shape=jax.ShapeDtypeStruct((Cout2, N * S), jnp.float32),
        grid=(G,),
        in_specs=[
            pl.BlockSpec((Cin_p, L), lambda g: (0, g)),              # input lanes for this step
            pl.BlockSpec((C1_p, KK * Cin_p), lambda g: (0, 0)),      # slab weights 1 (resident)
            pl.BlockSpec((C1_p, 1), lambda g: (0, 0)),               # BN shift 1
            pl.BlockSpec((Cout2, KK * C1_p), lambda g: (0, 0)),      # slab weights 2
            pl.BlockSpec((Cout2, 1), lambda g: (0, 0)),              # BN shift 2
            pl.BlockSpec((KK, 1, L), lambda g: (0, 0, 0)),           # tap masks
        ],
        out_specs=pl.BlockSpec((Cout2, L), lambda g: (0, g)),        # lane-dense output
        compiler_params=pltpu.CompilerParams(
            dimension_semantics=("parallel",) if G > 1 else ("arbitrary",)),
    )(x_cm, w1, s1, w2, s2, masks)

    return jnp.transpose(out.reshape(Cout2, N, S), (1, 0, 2)).reshape(N, Cout2, H, W)


def init_params(key, in_channels, out_channels, kernel_size):
    """Deterministic synthetic parameters (no checkpoint load)."""
    def one_block(k, cin, cout):
        kw_, kg, kb, km, kv = jax.random.split(k, 5)
        return {
            "w": 0.1 * jax.random.normal(kw_, (cout, cin, kernel_size, kernel_size), jnp.float32),
            "gamma": 0.5 + jax.random.uniform(kg, (cout,), jnp.float32),
            "beta": 0.1 * jax.random.normal(kb, (cout,), jnp.float32),
            "rmean": 0.1 * jax.random.normal(km, (cout,), jnp.float32),
            "rvar": 0.5 + jax.random.uniform(kv, (cout,), jnp.float32),
        }

    k0, k1 = jax.random.split(key)
    return {
        "block0": one_block(k0, in_channels, out_channels),
        "block1": one_block(k1, out_channels, out_channels),
    }


def _reference(x_nchw, params, *, padding):
    """Plain-JAX reference (lax conv) for a correctness sanity check."""
    x = x_nchw
    for blk in ("block0", "block1"):
        p = params[blk]
        x = jax.lax.conv_general_dilated(
            x, p["w"], window_strides=(1, 1),
            padding=[(padding, padding), (padding, padding)],
            dimension_numbers=("NCHW", "OIHW", "NCHW"),
        )
        inv_std = 1.0 / jnp.sqrt(p["rvar"] + EPS)
        scale = (p["gamma"] * inv_std).reshape(1, -1, 1, 1)
        shift = (p["beta"] - p["rmean"] * p["gamma"] * inv_std).reshape(1, -1, 1, 1)
        x = jnp.maximum(x * scale + shift, 0.0)
    return x


if __name__ == "__main__":
    # Module config: DoubleConv2DReLU(in_channels=4, out_channels=8, kernel_size=3,
    #                                 padding=1, stride=1, use_batchnorm=True)
    in_channels, out_channels, kernel_size, padding = 4, 8, 3, 1
    N, H, W = 2, 16, 16

    key = jax.random.PRNGKey(0)
    kx, kp = jax.random.split(key)
    x = jax.random.normal(kx, (N, in_channels, H, W), jnp.float32)
    params = init_params(kp, in_channels, out_channels, kernel_size)

    fwd = jax.jit(functools.partial(double_conv2d_relu, padding=padding))
    y = fwd(x, params)
    y = jax.block_until_ready(y)

    assert y.shape == (N, out_channels, H, W), y.shape

    y_ref = _reference(x, params, padding=padding)
    if not jnp.allclose(y, y_ref, atol=1e-4, rtol=1e-4):
        raise AssertionError("Pallas kernel output does not match reference")

    print("KERNEL_OK")
</pallas_src>

<mosaic_0001>
module attributes {stable_mosaic.version = 11 : i64} {
  func.func @_double_conv_kernel(%arg0: i32, %arg1: memref<8x512xf32, #tpu.memory_space<vmem>>, %arg2: memref<8x72xf32, #tpu.memory_space<vmem>>, %arg3: memref<8x1xf32, #tpu.memory_space<vmem>>, %arg4: memref<8x72xf32, #tpu.memory_space<vmem>>, %arg5: memref<8x1xf32, #tpu.memory_space<vmem>>, %arg6: memref<9x1x512xf32, #tpu.memory_space<vmem>>, %arg7: memref<8x512xf32, #tpu.memory_space<vmem>>) attributes {dimension_semantics = [#tpu.dimension_semantics<arbitrary>], iteration_bounds = array<i64: 1>, scalar_prefetch = 0 : i64, scratch_operands = 0 : i64, tpu.core_type = #tpu.core_type<tc>, window_params = [{transform_indices = @transform_0, window_bounds = array<i64: 8, 512>}, {pipeline_mode = #tpu.pipeline_mode<synchronous>, transform_indices = @transform_1, window_bounds = array<i64: 8, 72>}, {pipeline_mode = #tpu.pipeline_mode<synchronous>, transform_indices = @transform_2, window_bounds = array<i64: 8, 1>}, {pipeline_mode = #tpu.pipeline_mode<synchronous>, transform_indices = @transform_3, window_bounds = array<i64: 8, 72>}, {pipeline_mode = #tpu.pipeline_mode<synchronous>, transform_indices = @transform_4, window_bounds = array<i64: 8, 1>}, {pipeline_mode = #tpu.pipeline_mode<synchronous>, transform_indices = @transform_5, window_bounds = array<i64: 9, 1, 512>}, {transform_indices = @transform_6, window_bounds = array<i64: 8, 512>}]} {
    %c0 = arith.constant 0 : index
    %c0_0 = arith.constant 0 : index
    %0 = vector.load %arg1[%c0, %c0_0] : memref<8x512xf32, #tpu.memory_space<vmem>>, vector<8x512xf32>
    %c17_i32 = arith.constant 17 : i32
    %1 = tpu.dynamic_rotate %0 by %c17_i32 dim 1 : vector<8x512xf32>, i32 -> vector<8x512xf32>
    %c0_1 = arith.constant 0 : index
    %c0_2 = arith.constant 0 : index
    %c0_3 = arith.constant 0 : index
    %2 = vector.load %arg6[%c0_1, %c0_2, %c0_3] : memref<9x1x512xf32, #tpu.memory_space<vmem>>, vector<1x1x512xf32>
    %3 = vector.shape_cast %2 : vector<1x1x512xf32> to vector<1x512xf32>
    %4 = vector.broadcast %3 : vector<1x512xf32> to vector<8x512xf32>
    %5 = arith.mulf %1, %4 : vector<8x512xf32>
    %c16_i32 = arith.constant 16 : i32
    %6 = tpu.dynamic_rotate %0 by %c16_i32 dim 1 : vector<8x512xf32>, i32 -> vector<8x512xf32>
    %c1 = arith.constant 1 : index
    %c0_4 = arith.constant 0 : index
    %c0_5 = arith.constant 0 : index
    %7 = vector.load %arg6[%c1, %c0_4, %c0_5] : memref<9x1x512xf32, #tpu.memory_space<vmem>>, vector<1x1x512xf32>
    %8 = vector.shape_cast %7 : vector<1x1x512xf32> to vector<1x512xf32>
    %9 = vector.broadcast %8 : vector<1x512xf32> to vector<8x512xf32>
    %10 = arith.mulf %6, %9 : vector<8x512xf32>
    %c15_i32 = arith.constant 15 : i32
    %11 = tpu.dynamic_rotate %0 by %c15_i32 dim 1 : vector<8x512xf32>, i32 -> vector<8x512xf32>
    %c2 = arith.constant 2 : index
    %c0_6 = arith.constant 0 : index
    %c0_7 = arith.constant 0 : index
    %12 = vector.load %arg6[%c2, %c0_6, %c0_7] : memref<9x1x512xf32, #tpu.memory_space<vmem>>, vector<1x1x512xf32>
    %13 = vector.shape_cast %12 : vector<1x1x512xf32> to vector<1x512xf32>
    %14 = vector.broadcast %13 : vector<1x512xf32> to vector<8x512xf32>
    %15 = arith.mulf %11, %14 : vector<8x512xf32>
    %c1_i32 = arith.constant 1 : i32
    %16 = tpu.dynamic_rotate %0 by %c1_i32 dim 1 : vector<8x512xf32>, i32 -> vector<8x512xf32>
    %c3 = arith.constant 3 : index
    %c0_8 = arith.constant 0 : index
    %c0_9 = arith.constant 0 : index
    %17 = vector.load %arg6[%c3, %c0_8, %c0_9] : memref<9x1x512xf32, #tpu.memory_space<vmem>>, vector<1x1x512xf32>
    %18 = vector.shape_cast %17 : vector<1x1x512xf32> to vector<1x512xf32>
    %19 = vector.broadcast %18 : vector<1x512xf32> to vector<8x512xf32>
    %20 = arith.mulf %16, %19 : vector<8x512xf32>
    %c511_i32 = arith.constant 511 : i32
    %21 = tpu.dynamic_rotate %0 by %c511_i32 dim 1 : vector<8x512xf32>, i32 -> vector<8x512xf32>
    %c5 = arith.constant 5 : index
    %c0_10 = arith.constant 0 : index
    %c0_11 = arith.constant 0 : index
    %22 = vector.load %arg6[%c5, %c0_10, %c0_11] : memref<9x1x512xf32, #tpu.memory_space<vmem>>, vector<1x1x512xf32>
    %23 = vector.shape_cast %22 : vector<1x1x512xf32> to vector<1x512xf32>
    %24 = vector.broadcast %23 : vector<1x512xf32> to vector<8x512xf32>
    %25 = arith.mulf %21, %24 : vector<8x512xf32>
    %c497_i32 = arith.constant 497 : i32
    %26 = tpu.dynamic_rotate %0 by %c497_i32 dim 1 : vector<8x512xf32>, i32 -> vector<8x512xf32>
    %c6 = arith.constant 6 : index
    %c0_12 = arith.constant 0 : index
    %c0_13 = arith.constant 0 : index
    %27 = vector.load %arg6[%c6, %c0_12, %c0_13] : memref<9x1x512xf32, #tpu.memory_space<vmem>>, vector<1x1x512xf32>
    %28 = vector.shape_cast %27 : vector<1x1x512xf32> to vector<1x512xf32>
    %29 = vector.broadcast %28 : vector<1x512xf32> to vector<8x512xf32>
    %30 = arith.mulf %26, %29 : vector<8x512xf32>
    %c496_i32 = arith.constant 496 : i32
    %31 = tpu.dynamic_rotate %0 by %c496_i32 dim 1 : vector<8x512xf32>, i32 -> vector<8x512xf32>
    %c7 = arith.constant 7 : index
    %c0_14 = arith.constant 0 : index
    %c0_15 = arith.constant 0 : index
    %32 = vector.load %arg6[%c7, %c0_14, %c0_15] : memref<9x1x512xf32, #tpu.memory_space<vmem>>, vector<1x1x512xf32>
    %33 = vector.shape_cast %32 : vector<1x1x512xf32> to vector<1x512xf32>
    %34 = vector.broadcast %33 : vector<1x512xf32> to vector<8x512xf32>
    %35 = arith.mulf %31, %34 : vector<8x512xf32>
    %c495_i32 = arith.constant 495 : i32
    %36 = tpu.dynamic_rotate %0 by %c495_i32 dim 1 : vector<8x512xf32>, i32 -> vector<8x512xf32>
    %c8 = arith.constant 8 : index
    %c0_16 = arith.constant 0 : index
    %c0_17 = arith.constant 0 : index
    %37 = vector.load %arg6[%c8, %c0_16, %c0_17] : memref<9x1x512xf32, #tpu.memory_space<vmem>>, vector<1x1x512xf32>
    %38 = vector.shape_cast %37 : vector<1x1x512xf32> to vector<1x512xf32>
    %39 = vector.broadcast %38 : vector<1x512xf32> to vector<8x512xf32>
    %40 = arith.mulf %36, %39 : vector<8x512xf32>
    %41 = tpu.concatenate %5, %10, %15, %20, %0, %25, %30, %35, %40 in 0 : vector<8x512xf32>, vector<8x512xf32>, vector<8x512xf32>, vector<8x512xf32>, vector<8x512xf32>, vector<8x512xf32>, vector<8x512xf32>, vector<8x512xf32>, vector<8x512xf32> -> vector<72x512xf32>
    %c0_18 = arith.constant 0 : index
    %c0_19 = arith.constant 0 : index
    %42 = vector.load %arg2[%c0_18, %c0_19] : memref<8x72xf32, #tpu.memory_space<vmem>>, vector<8x72xf32>
    %cst = arith.constant dense<0.000000e+00> : vector<8x512xf32>
    %43 = tpu.matmul %42, %41, %cst {dimension_numbers = #tpu.dot_dimension_numbers<[1], [0], [0], [1], [0, 0, 1, 1], [], []>} : vector<8x72xf32>, vector<72x512xf32>, vector<8x512xf32> -> vector<8x512xf32>
    %c0_20 = arith.constant 0 : index
    %c0_21 = arith.constant 0 : index
    %44 = vector.load %arg3[%c0_20, %c0_21] : memref<8x1xf32, #tpu.memory_space<vmem>>, vector<8x1xf32>
    %45 = vector.broadcast %44 : vector<8x1xf32> to vector<8x512xf32>
    %46 = arith.addf %43, %45 : vector<8x512xf32>
    %cst_22 = arith.constant 0.000000e+00 : f32
    %47 = vector.broadcast %cst_22 : f32 to vector<8x512xf32>
    %48 = arith.maximumf %46, %47 : vector<8x512xf32>
    %c17_i32_23 = arith.constant 17 : i32
    %49 = tpu.dynamic_rotate %48 by %c17_i32_23 dim 1 : vector<8x512xf32>, i32 -> vector<8x512xf32>
    %c0_24 = arith.constant 0 : index
    %c0_25 = arith.constant 0 : index
    %c0_26 = arith.constant 0 : index
    %50 = vector.load %arg6[%c0_24, %c0_25, %c0_26] : memref<9x1x512xf32, #tpu.memory_space<vmem>>, vector<1x1x512xf32>
    %51 = vector.shape_cast %50 : vector<1x1x512xf32> to vector<1x512xf32>
    %52 = vector.broadcast %51 : vector<1x512xf32> to vector<8x512xf32>
    %53 = arith.mulf %49, %52 : vector<8x512xf32>
    %c16_i32_27 = arith.constant 16 : i32
    %54 = tpu.dynamic_rotate %48 by %c16_i32_27 dim 1 : vector<8x512xf32>, i32 -> vector<8x512xf32>
    %c1_28 = arith.constant 1 : index
    %c0_29 = arith.constant 0 : index
    %c0_30 = arith.constant 0 : index
    %55 = vector.load %arg6[%c1_28, %c0_29, %c0_30] : memref<9x1x512xf32, #tpu.memory_space<vmem>>, vector<1x1x512xf32>
    %56 = vector.shape_cast %55 : vector<1x1x512xf32> to vector<1x512xf32>
    %57 = vector.broadcast %56 : vector<1x512xf32> to vector<8x512xf32>
    %58 = arith.mulf %54, %57 : vector<8x512xf32>
    %c15_i32_31 = arith.constant 15 : i32
    %59 = tpu.dynamic_rotate %48 by %c15_i32_31 dim 1 : vector<8x512xf32>, i32 -> vector<8x512xf32>
    %c2_32 = arith.constant 2 : index
    %c0_33 = arith.constant 0 : index
    %c0_34 = arith.constant 0 : index
    %60 = vector.load %arg6[%c2_32, %c0_33, %c0_34] : memref<9x1x512xf32, #tpu.memory_space<vmem>>, vector<1x1x512xf32>
    %61 = vector.shape_cast %60 : vector<1x1x512xf32> to vector<1x512xf32>
    %62 = vector.broadcast %61 : vector<1x512xf32> to vector<8x512xf32>
    %63 = arith.mulf %59, %62 : vector<8x512xf32>
    %c1_i32_35 = arith.constant 1 : i32
    %64 = tpu.dynamic_rotate %48 by %c1_i32_35 dim 1 : vector<8x512xf32>, i32 -> vector<8x512xf32>
    %c3_36 = arith.constant 3 : index
    %c0_37 = arith.constant 0 : index
    %c0_38 = arith.constant 0 : index
    %65 = vector.load %arg6[%c3_36, %c0_37, %c0_38] : memref<9x1x512xf32, #tpu.memory_space<vmem>>, vector<1x1x512xf32>
    %66 = vector.shape_cast %65 : vector<1x1x512xf32> to vector<1x512xf32>
    %67 = vector.broadcast %66 : vector<1x512xf32> to vector<8x512xf32>
    %68 = arith.mulf %64, %67 : vector<8x512xf32>
    %c511_i32_39 = arith.constant 511 : i32
    %69 = tpu.dynamic_rotate %48 by %c511_i32_39 dim 1 : vector<8x512xf32>, i32 -> vector<8x512xf32>
    %c5_40 = arith.constant 5 : index
    %c0_41 = arith.constant 0 : index
    %c0_42 = arith.constant 0 : index
    %70 = vector.load %arg6[%c5_40, %c0_41, %c0_42] : memref<9x1x512xf32, #tpu.memory_space<vmem>>, vector<1x1x512xf32>
    %71 = vector.shape_cast %70 : vector<1x1x512xf32> to vector<1x512xf32>
    %72 = vector.broadcast %71 : vector<1x512xf32> to vector<8x512xf32>
    %73 = arith.mulf %69, %72 : vector<8x512xf32>
    %c497_i32_43 = arith.constant 497 : i32
    %74 = tpu.dynamic_rotate %48 by %c497_i32_43 dim 1 : vector<8x512xf32>, i32 -> vector<8x512xf32>
    %c6_44 = arith.constant 6 : index
    %c0_45 = arith.constant 0 : index
    %c0_46 = arith.constant 0 : index
    %75 = vector.load %arg6[%c6_44, %c0_45, %c0_46] : memref<9x1x512xf32, #tpu.memory_space<vmem>>, vector<1x1x512xf32>
    %76 = vector.shape_cast %75 : vector<1x1x512xf32> to vector<1x512xf32>
    %77 = vector.broadcast %76 : vector<1x512xf32> to vector<8x512xf32>
    %78 = arith.mulf %74, %77 : vector<8x512xf32>
    %c496_i32_47 = arith.constant 496 : i32
    %79 = tpu.dynamic_rotate %48 by %c496_i32_47 dim 1 : vector<8x512xf32>, i32 -> vector<8x512xf32>
    %c7_48 = arith.constant 7 : index
    %c0_49 = arith.constant 0 : index
    %c0_50 = arith.constant 0 : index
    %80 = vector.load %arg6[%c7_48, %c0_49, %c0_50] : memref<9x1x512xf32, #tpu.memory_space<vmem>>, vector<1x1x512xf32>
    %81 = vector.shape_cast %80 : vector<1x1x512xf32> to vector<1x512xf32>
    %82 = vector.broadcast %81 : vector<1x512xf32> to vector<8x512xf32>
    %83 = arith.mulf %79, %82 : vector<8x512xf32>
    %c495_i32_51 = arith.constant 495 : i32
    %84 = tpu.dynamic_rotate %48 by %c495_i32_51 dim 1 : vector<8x512xf32>, i32 -> vector<8x512xf32>
    %c8_52 = arith.constant 8 : index
    %c0_53 = arith.constant 0 : index
    %c0_54 = arith.constant 0 : index
    %85 = vector.load %arg6[%c8_52, %c0_53, %c0_54] : memref<9x1x512xf32, #tpu.memory_space<vmem>>, vector<1x1x512xf32>
    %86 = vector.shape_cast %85 : vector<1x1x512xf32> to vector<1x512xf32>
    %87 = vector.broadcast %86 : vector<1x512xf32> to vector<8x512xf32>
    %88 = arith.mulf %84, %87 : vector<8x512xf32>
    %89 = tpu.concatenate %53, %58, %63, %68, %48, %73, %78, %83, %88 in 0 : vector<8x512xf32>, vector<8x512xf32>, vector<8x512xf32>, vector<8x512xf32>, vector<8x512xf32>, vector<8x512xf32>, vector<8x512xf32>, vector<8x512xf32>, vector<8x512xf32> -> vector<72x512xf32>
    %c0_55 = arith.constant 0 : index
    %c0_56 = arith.constant 0 : index
    %90 = vector.load %arg4[%c0_55, %c0_56] : memref<8x72xf32, #tpu.memory_space<vmem>>, vector<8x72xf32>
    %cst_57 = arith.constant dense<0.000000e+00> : vector<8x512xf32>
    %91 = tpu.matmul %90, %89, %cst_57 {dimension_numbers = #tpu.dot_dimension_numbers<[1], [0], [0], [1], [0, 0, 1, 1], [], []>} : vector<8x72xf32>, vector<72x512xf32>, vector<8x512xf32> -> vector<8x512xf32>
    %c0_58 = arith.constant 0 : index
    %c0_59 = arith.constant 0 : index
    %92 = vector.load %arg5[%c0_58, %c0_59] : memref<8x1xf32, #tpu.memory_space<vmem>>, vector<8x1xf32>
    %93 = vector.broadcast %92 : vector<8x1xf32> to vector<8x512xf32>
    %94 = arith.addf %91, %93 : vector<8x512xf32>
    %cst_60 = arith.constant 0.000000e+00 : f32
    %95 = vector.broadcast %cst_60 : f32 to vector<8x512xf32>
    %96 = arith.maximumf %94, %95 : vector<8x512xf32>
    %c0_61 = arith.constant 0 : index
    %c0_62 = arith.constant 0 : index
    %97 = vector.load %arg7[%c0_61, %c0_62] : memref<8x512xf32, #tpu.memory_space<vmem>>, vector<8x512xf32>
    tpu.vector_store %arg7[%c0_61, %c0_62], %96 {strides = array<i32>} : memref<8x512xf32, #tpu.memory_space<vmem>>, vector<8x512xf32>,
    return
  }
  func.func @transform_0(%arg0: i32) -> (i32, i32) {
    %c0_i32 = arith.constant 0 : i32
    %c0_i32_0 = arith.constant 0 : i32
    return %c0_i32, %arg0 : i32, i32
  }
  func.func @transform_1(%arg0: i32) -> (i32, i32) {
    %c0_i32 = arith.constant 0 : i32
    %c0_i32_0 = arith.constant 0 : i32
    %c0_i32_1 = arith.constant 0 : i32
    return %c0_i32, %c0_i32_0 : i32, i32
  }
  func.func @transform_2(%arg0: i32) -> (i32, i32) {
    %c0_i32 = arith.constant 0 : i32
    %c0_i32_0 = arith.constant 0 : i32
    %c0_i32_1 = arith.constant 0 : i32
    return %c0_i32, %c0_i32_0 : i32, i32
  }
  func.func @transform_3(%arg0: i32) -> (i32, i32) {
    %c0_i32 = arith.constant 0 : i32
    %c0_i32_0 = arith.constant 0 : i32
    %c0_i32_1 = arith.constant 0 : i32
    return %c0_i32, %c0_i32_0 : i32, i32
  }
  func.func @transform_4(%arg0: i32) -> (i32, i32) {
    %c0_i32 = arith.constant 0 : i32
    %c0_i32_0 = arith.constant 0 : i32
    %c0_i32_1 = arith.constant 0 : i32
    return %c0_i32, %c0_i32_0 : i32, i32
  }
  func.func @transform_5(%arg0: i32) -> (i32, i32, i32) {
    %c0_i32 = arith.constant 0 : i32
    %c0_i32_0 = arith.constant 0 : i32
    %c0_i32_1 = arith.constant 0 : i32
    %c0_i32_2 = arith.constant 0 : i32
    return %c0_i32, %c0_i32_0, %c0_i32_1 : i32, i32, i32
  }
  func.func @transform_6(%arg0: i32) -> (i32, i32) {
    %c0_i32 = arith.constant 0 : i32
    %c0_i32_0 = arith.constant 0 : i32
    return %c0_i32, %arg0 : i32, i32
  }
}

</mosaic_0001>

<bundles_post_ra>
// kernel: double_conv2d_relu.1
= control target key start
LH: loop header
LB: loop body
LE: loop exit
PB: predicated region body
PF: predicated region fallthrough
CT: control target
= control target key end

     0   :  { %s883_s25 = smov 17   ;;  %s884_s30 = smov 16   ;;  %v890_v4 = vmov 0.0   ;;  %v891_v5 = vmov 0   ;;  %v35_v7 = vlaneseq  ;;  %vm355_vm8 = vcmask 588800   ;;  %s1454_s0 = inlined_call_operand.vmem [shape: f32[8,512], index: 0, kind: input, shape index: {}]   ;;  %s1455_s2 = inlined_call_operand.vmem [shape: f32[8,1], index: 2, kind: input, shape index: {}]   ;;  %s1456_s5 = inlined_call_operand.vmem [shape: f32[9,1,512], index: 5, kind: input, shape index: {}]   ;;  %s1457_s1 = inlined_call_operand.vmem [shape: f32[8,72], index: 1, kind: input, shape index: {}]   ;;  %s1458_s4 = inlined_call_operand.vmem [shape: f32[8,1], index: 4, kind: input, shape index: {}]   ;;  %s1459_s3 = inlined_call_operand.vmem [shape: f32[8,72], index: 3, kind: input, shape index: {}]   ;;  %s1460_s6 = inlined_call_operand.vmem [shape: f32[8,512], index: 6, kind: output, shape index: {}]  }
   0x1   :  { %v931_v0 = vld [vmem:[%s1454_s0 + $0x10] sm:$0xff]  ;;  %v936_v1 = vld [vmem:[%s1454_s0] sm:$0xff]  ;;  %v945_v2 = vld [vmem:[%s1454_s0 + $0x18] sm:$0xff]  ;;  %s886_s7 = smov 1   ;;  %s887_s8 = smov 127   ;;  %423 = vmatprep.mubr.f32.mxu0 %v890_v4  ;;  %494 = vmatprep.mubr.f32.mxu1 %v890_v4 }
   0x2   :  { %31 = vrot.lane.b32.xlu1 %v931_v0, %s883_s25  ;;  %27 = vrot.lane.b32.xlu0 %v936_v1, %s883_s25  ;;  %v950_v3 = vld [vmem:[%s1454_s0 + $0x8] sm:$0xff]  ;;  %s885_s0 = smov 15   ;;  %s888_s9 = smov 113   ;;  %v349_v6 = vld [vmem:[%s1455_s2] sm:$0xff]  ;;  %v45_v8 = vshrl.u32 %v35_v7, 7  ;;  %v1017_v11 = vand.u32 127, %v35_v7 }
   0x3   :  { %s889_s10 = smov 112   ;;  %882 = vset.pattern.permute.xlu0 %v891_v5  ;;  %s892_s11 = smov 111   ;;  %v42_v13 = vld [vmem:[%s1456_s5] sm:$0xf]  ;;  %v797_v14 = vld [vmem:[%s1456_s5 + $0x4] sm:$0xf] }
   0x4   :  { %v1019_v12 = vsub.s32 1, %v45_v8  ;;  %vm37_vm0 = vcmp.lt.s32.totalorder %v1017_v11, 17  ;;  %v1028_v15 = vsub.s32 0, %v45_v8  ;;  %v1030_v17 = vsub.s32 2, %v45_v8  ;;  %v798_v54 = vld [vmem:[%s1456_s5 + $0x8] sm:$0xf] }
   0x5   :  { %v1032_v19 = vsub.s32 3, %v45_v8  ;;  %vm76_vm1 = vcmp.lt.s32.totalorder %v1017_v11, 16  ;;  %v799_v55 = vld [vmem:[%s1456_s5 + $0xc] sm:$0xf]  ;;  %vm116_vm2 = vcmp.lt.s32.totalorder %v1017_v11, 15  ;;  %vm156_vm3 = vcmp.lt.s32.totalorder %v1017_v11, 1 }
   0x6   :  { %33 = vrot.lane.b32.xlu1 %v945_v2, %s883_s25  ;;  %29 = vrot.lane.b32.xlu0 %v950_v3, %s883_s25  ;;  %v1036_v20 = vrot.slane %v42_v13, %v1019_v12  ;;  %v1039_v21 = vrot.slane %v797_v14, %v1019_v12  ;;  %v1044_v23 = vrot.slane %v42_v13, %v1028_v15  ;;  %vm196_vm4 = vcmp.lt.s32.totalorder %v1017_v11, 127 }
   0x7   :  { %v1047_v24 = vrot.slane %v42_v13, %v1030_v17  ;;  %v1050_v27 = vrot.slane %v797_v14, %v1028_v15  ;;  %v1057_v30 = vrot.slane %v797_v14, %v1030_v17  ;;  %v1060_v31 = vrot.slane %v42_v13, %v1032_v19 }
   0x8   :  { %v1067_v35 = vrot.slane %v797_v14, %v1032_v19  ;;  %v1091_v58 = vrot.slane %v798_v54, %v1019_v12  ;;  %v1095_v59 = vrot.slane %v799_v55, %v1019_v12  ;;  %v1100_v61 = vrot.slane %v798_v54, %v1028_v15 }
   0x9   :  { %v1103_v62 = vrot.slane %v798_v54, %v1030_v17  ;;  %v1106_v63 = vrot.slane %v798_v54, %v1032_v19  ;;  %vm276_vm5 = vcmp.lt.s32.totalorder %v1017_v11, 112  ;;  %vm236_vm6 = vcmp.lt.s32.totalorder %v1017_v11, 113 }
   0xa   :  { %70 = vrot.lane.b32.xlu1 %v950_v3, %s884_s30  ;;  %68 = vrot.lane.b32.xlu0 %v936_v1, %s884_s30  ;;  %vm316_vm7 = vcmp.lt.s32.totalorder %v1017_v11, 111 }
   0xe   :  { %74 = vrot.lane.b32.xlu1 %v945_v2, %s884_s30  ;;  %72 = vrot.lane.b32.xlu0 %v931_v0, %s884_s30 }
  0x12   :  { %110 = vrot.lane.b32.xlu1 %v950_v3, %s885_s0  ;;  %108 = vrot.lane.b32.xlu0 %v936_v1, %s885_s0 }
  0x16   :  { %114 = vrot.lane.b32.xlu1 %v945_v2, %s885_s0  ;;  %112 = vrot.lane.b32.xlu0 %v931_v0, %s885_s0 }
  0x1a   :  { %150 = vrot.lane.b32.xlu1 %v950_v3, %s886_s7  ;;  %148 = vrot.lane.b32.xlu0 %v936_v1, %s886_s7 }
  0x1e   :  { %154 = vrot.lane.b32.xlu1 %v945_v2, %s886_s7  ;;  %152 = vrot.lane.b32.xlu0 %v931_v0, %s886_s7 }
  0x22   :  { %190 = vrot.lane.b32.xlu1 %v950_v3, %s887_s8  ;;  %188 = vrot.lane.b32.xlu0 %v936_v1, %s887_s8 }
  0x26   :  { %194 = vrot.lane.b32.xlu1 %v945_v2, %s887_s8  ;;  %192 = vrot.lane.b32.xlu0 %v931_v0, %s887_s8 }
  0x2a   :  { %230 = vrot.lane.b32.xlu1 %v950_v3, %s888_s9  ;;  %228 = vrot.lane.b32.xlu0 %v936_v1, %s888_s9 }
  0x2e   :  { %234 = vrot.lane.b32.xlu1 %v945_v2, %s888_s9  ;;  %232 = vrot.lane.b32.xlu0 %v931_v0, %s888_s9 }
  0x32   :  { %270 = vrot.lane.b32.xlu1 %v950_v3, %s889_s10  ;;  %268 = vrot.lane.b32.xlu0 %v936_v1, %s889_s10 }
  0x36   :  { %274 = vrot.lane.b32.xlu1 %v945_v2, %s889_s10  ;;  %272 = vrot.lane.b32.xlu0 %v931_v0, %s889_s10 }
  0x3a   :  { %310 = vrot.lane.b32.xlu1 %v950_v3, %s892_s11  ;;  %308 = vrot.lane.b32.xlu0 %v936_v1, %s892_s11 }
  0x3e   :  { %314 = vrot.lane.b32.xlu1 %v945_v2, %s892_s11  ;;  %312 = vrot.lane.b32.xlu0 %v931_v0, %s892_s11 }
  0x42   :  { %352 = vperm.xlu0 %882, %v349_v6  }
  0x74   :  { %v32_v9 = vpop.permute.xlu1 %31  ;;  %v28_v10 = vpop.permute.xlu0 %27 }
  0x78   :  { %v34_v16 = vpop.permute.xlu1 %33  ;;  %v30_v18 = vpop.permute.xlu0 %29 }
  0x79   :  { %v40_v22 = vsel %vm37_vm0, %v28_v10, %v30_v18  ;;  %v41_v28 = vsel %vm37_vm0, %v34_v16, %v28_v10  ;;  %v39_v32 = vsel %vm37_vm0, %v30_v18, %v32_v9  ;;  %v38_v36 = vsel %vm37_vm0, %v32_v9, %v34_v16 }
  0x7a   :  { %v65_v33 = vmul.f32 %v1036_v20, %v40_v22  ;;  %v64_v37 = vmul.f32 %v1044_v23, %v41_v28  ;;  %v66_v41 = vmul.f32 %v1047_v24, %v39_v32  ;;  %v67_v47 = vmul.f32 %v1060_v31, %v38_v36 }
  0x7b   :  { %v1113_v9 = vrot.slane %v799_v55, %v1028_v15  ;;  %v1116_v10 = vrot.slane %v799_v55, %v1030_v17  ;;  %v1123_v18 = vrot.slane %v799_v55, %v1032_v19 }
  0x7c   :  { %v71_v25 = vpop.permute.xlu1 %70  ;;  %v69_v26 = vpop.permute.xlu0 %68 }
  0x7d   :  { %v79_v29 = vsel %vm76_vm1, %v69_v26, %v71_v25 }
  0x7e   :  { %v105_v34 = vmul.f32 %v1039_v21, %v79_v29 }
  0x80   :  { %v75_v38 = vpop.permute.xlu1 %74  ;;  %v73_v39 = vpop.permute.xlu0 %72  ;;  %v808_v40 = vpack.c.bf16 %v105_v34, %v65_v33 }
  0x81   :  { %v80_v42 = vsel %vm76_vm1, %v75_v38, %v69_v26  ;;  %v77_v43 = vsel %vm76_vm1, %v73_v39, %v75_v38  ;;  %v78_v44 = vsel %vm76_vm1, %v71_v25, %v73_v39 }
  0x82   :  { %v104_v45 = vmul.f32 %v1050_v27, %v80_v42  ;;  %v106_v46 = vmul.f32 %v1057_v30, %v78_v44  ;;  %809 = vmatprep.subr.bf16.mxu0 %v808_v40  ;;  %v107_v48 = vmul.f32 %v1067_v35, %v77_v43 }
  0x84   :  { %v111_v49 = vpop.permute.xlu1 %110  ;;  %v109_v50 = vpop.permute.xlu0 %108  ;;  %v810_v51 = vpack.c.bf16 %v104_v45, %v64_v37  ;;  %v824_v52 = vpack.c.bf16 %v107_v48, %v67_v47  ;;  %v826_v53 = vpack.c.bf16 %v106_v46, %v66_v41  ;;  %v800_v41 = vld [vmem:[%s1456_s5 + $0x14] sm:$0xf] }
  0x85   :  { %v119_v60 = vsel %vm116_vm2, %v109_v50, %v111_v49  ;;  %v1144_v47 = vrot.slane %v800_v41, %v1028_v15  ;;  %v1147_v48 = vrot.slane %v800_v41, %v1032_v19 }
  0x86   :  { %811 = vmatpush1.bf16.msra.mxu0 %v810_v51  ;;  %825 = vmatprep.subr.bf16.mxu1 %v824_v52  ;;  %v145_v13 = vmul.f32 %v1091_v58, %v119_v60  ;;  %v1155_v51 = vrot.slane %v800_v41, %v1030_v17 }
  0x87   :  { %827 = vmatpush1.bf16.msra.mxu1 %v826_v53 }
  0x88   :  { %v115_v56 = vpop.permute.xlu1 %114  ;;  %v113_v57 = vpop.permute.xlu0 %112 }
  0x89   :  { %v120_v7 = vsel %vm116_vm2, %v115_v56, %v109_v50  ;;  %v118_v14 = vsel %vm116_vm2, %v111_v49, %v113_v57  ;;  %v117_v22 = vsel %vm116_vm2, %v113_v57, %v115_v56  ;;  %v1152_v50 = vrot.slane %v800_v41, %v1019_v12 }
  0x8a   :  { %v144_v25 = vmul.f32 %v1100_v61, %v120_v7  ;;  %v146_v32 = vmul.f32 %v1103_v62, %v118_v14  ;;  %v147_v37 = vmul.f32 %v1106_v63, %v117_v22 }
  0x8c   :  { %v151_v5 = vpop.permute.xlu1 %150  ;;  %v149_v6 = vpop.permute.xlu0 %148 }
  0x8d   :  { %v159_v8 = vsel %vm156_vm3, %v149_v6, %v151_v5 }
  0x8e   :  { %v185_v16 = vmul.f32 %v1095_v59, %v159_v8 }
  0x90   :  { %v155_v26 = vpop.permute.xlu1 %154  ;;  %v153_v28 = vpop.permute.xlu0 %152  ;;  %v812_v29 = vpack.c.bf16 %v185_v16, %v145_v13 }
  0x91   :  { %v160_v33 = vsel %vm156_vm3, %v155_v26, %v149_v6  ;;  %v157_v34 = vsel %vm156_vm3, %v153_v28, %v155_v26  ;;  %v158_v36 = vsel %vm156_vm3, %v151_v5, %v153_v28  ;;  %v802_v28 = vld [vmem:[%s1456_s5 + $0x1c] sm:$0xf] }
  0x92   :  { %v184_v38 = vmul.f32 %v1113_v9, %v160_v33  ;;  %v186_v39 = vmul.f32 %v1116_v10, %v158_v36  ;;  %v187_v40 = vmul.f32 %v1123_v18, %v157_v34  ;;  %813 = vmatprep.subr.bf16.mxu0 %v812_v29  ;;  %v1193_v36 = vrot.slane %v802_v28, %v1028_v15 }
  0x94   :  { %v191_v42 = vpop.permute.xlu1 %190  ;;  %v189_v43 = vpop.permute.xlu0 %188  ;;  %v814_v44 = vpack.c.bf16 %v184_v38, %v144_v25  ;;  %v828_v45 = vpack.c.bf16 %v187_v40, %v147_v37  ;;  %v830_v46 = vpack.c.bf16 %v186_v39, %v146_v32  ;;  %v1198_v38 = vrot.slane %v802_v28, %v1032_v19 }
  0x95   :  { %v199_v49 = vsel %vm196_vm4, %v189_v43, %v191_v42  ;;  %v1201_v39 = vrot.slane %v802_v28, %v1019_v12  ;;  %v1204_v40 = vrot.slane %v802_v28, %v1030_v17 }
  0x96   :  { %815 = vmatpush1.bf16.msra.mxu0 %v814_v44  ;;  %829 = vmatprep.subr.bf16.mxu1 %v828_v45  ;;  %v224_v54 = vmul.f32 %v1144_v47, %v199_v49 }
  0x97   :  { %831 = vmatpush1.bf16.msra.mxu1 %v830_v46 }
  0x98   :  { %v195_v52 = vpop.permute.xlu1 %194  ;;  %v193_v53 = vpop.permute.xlu0 %192  ;;  %v818_v22 = vpack.c.bf16 %v224_v54, %v936_v1 }
  0x99   :  { %v200_v55 = vsel %vm196_vm4, %v195_v52, %v189_v43  ;;  %v197_v56 = vsel %vm196_vm4, %v193_v53, %v195_v52  ;;  %v198_v57 = vsel %vm196_vm4, %v191_v42, %v193_v53 }
  0x9a   :  { %v227_v60 = vmul.f32 %v1147_v48, %v200_v55  ;;  %v225_v5 = vmul.f32 %v1152_v50, %v198_v57  ;;  %v226_v6 = vmul.f32 %v1155_v51, %v197_v56 }
  0x9c   :  { %v231_v7 = vpop.permute.xlu1 %230  ;;  %v229_v8 = vpop.permute.xlu0 %228  ;;  %v816_v13 = vpack.c.bf16 %v225_v5, %v950_v3  ;;  %v832_v14 = vpack.c.bf16 %v227_v60, %v945_v2  ;;  %v834_v16 = vpack.c.bf16 %v226_v6, %v931_v0  ;;  %v801_v3 = vld [vmem:[%s1456_s5 + $0x18] sm:$0xf] }
  0x9d   :  { %v1180_v0 = vrot.slane %v801_v3, %v1032_v19  ;;  %v1183_v1 = vrot.slane %v801_v3, %v1019_v12  ;;  %v1188_v33 = vrot.slane %v801_v3, %v1030_v17  ;;  %v1207_v41 = vrot.slane %v801_v3, %v1028_v15 }
  0x9e   :  { %817 = vmatprep.subr.bf16.mxu0 %v816_v13  ;;  %833 = vmatprep.subr.bf16.mxu1 %v832_v14  ;;  %v239_v43 = vsel %vm236_vm6, %v229_v8, %v231_v7 }
  0x9f   :  { %819 = vmatpush1.bf16.msra.mxu0 %v818_v22  ;;  %835 = vmatpush1.bf16.msra.mxu1 %v834_v16  ;;  %v264_v6 = vmul.f32 %v1207_v41, %v239_v43 }
  0xa0   :  { %v235_v25 = vpop.permute.xlu1 %234  ;;  %v233_v26 = vpop.permute.xlu0 %232 }
  0xa1   :  { %v240_v32 = vsel %vm236_vm6, %v235_v25, %v229_v8  ;;  %v238_v34 = vsel %vm236_vm6, %v231_v7, %v233_v26  ;;  %v237_v42 = vsel %vm236_vm6, %v233_v26, %v235_v25  ;;  %v803_v8 = vld [vmem:[%s1456_s5 + $0x20] sm:$0xf] }
  0xa2   :  { %v267_v44 = vmul.f32 %v1180_v0, %v240_v32  ;;  %v265_v45 = vmul.f32 %v1183_v1, %v238_v34  ;;  %v266_v56 = vmul.f32 %v1188_v33, %v237_v42  ;;  %v1232_v26 = vrot.slane %v803_v8, %v1032_v19 }
  0xa3   :  { %v1235_v28 = vrot.slane %v803_v8, %v1019_v12  ;;  %v1238_v3 = vrot.slane %v803_v8, %v1030_v17 }
  0xa4   :  { %v271_v2 = vpop.permute.xlu1 %270  ;;  %v269_v29 = vpop.permute.xlu0 %268 }
  0xa5   :  { %v279_v37 = vsel %vm276_vm5, %v269_v29, %v271_v2 }
  0xa6   :  { %v304_v52 = vmul.f32 %v1193_v36, %v279_v37 }
  0xa8   :  { %v275_v46 = vpop.permute.xlu1 %274  ;;  %v273_v49 = vpop.permute.xlu0 %272  ;;  %v822_v25 = vpack.c.bf16 %v304_v52, %v264_v6 }
  0xa9   :  { %v280_v53 = vsel %vm276_vm5, %v275_v46, %v269_v29  ;;  %v277_v54 = vsel %vm276_vm5, %v273_v49, %v275_v46  ;;  %v278_v55 = vsel %vm276_vm5, %v271_v2, %v273_v49  ;;  %v1241_v2 = vrot.slane %v803_v8, %v1028_v15 }
  0xaa   :  { %v307_v57 = vmul.f32 %v1198_v38, %v280_v53  ;;  %v305_v60 = vmul.f32 %v1201_v39, %v278_v55  ;;  %v306_v5 = vmul.f32 %v1204_v40, %v277_v54 }
  0xac   :  { %v311_v7 = vpop.permute.xlu1 %310  ;;  %v309_v13 = vpop.permute.xlu0 %308  ;;  %v820_v14 = vpack.c.bf16 %v305_v60, %v265_v45  ;;  %v836_v16 = vpack.c.bf16 %v307_v57, %v267_v44  ;;  %v838_v22 = vpack.c.bf16 %v306_v5, %v266_v56  ;;  %v348_v44 = vld [vmem:[%s1457_s1] sm:$0xff] }
  0xad   :  { %v319_v29 = vsel %vm316_vm7, %v309_v13, %v311_v7 }
  0xae   :  { %821 = vmatprep.subr.bf16.mxu0 %v820_v14  ;;  %837 = vmatprep.subr.bf16.mxu1 %v836_v16  ;;  %v344_v43 = vmul.f32 %v1241_v2, %v319_v29 }
  0xaf   :  { %823 = vmatpush1.bf16.msra.mxu0 %v822_v25  ;;  %839 = vmatpush1.bf16.msra.mxu1 %v838_v22 }
  0xb0   :  { %v315_v32 = vpop.permute.xlu1 %314  ;;  %v313_v34 = vpop.permute.xlu0 %312 }
  0xb1   :  { %v320_v19 = vsel %vm316_vm7, %v315_v32, %v309_v13  ;;  %v317_v12 = vsel %vm316_vm7, %v313_v34, %v315_v32  ;;  %v318_v17 = vsel %vm316_vm7, %v311_v7, %v313_v34  ;;  %v634_v7 = vld [vmem:[%s1458_s4] sm:$0xff] }
  0xb2   :  { %v347_v37 = vmul.f32 %v1232_v26, %v320_v19  ;;  %v345_v15 = vmul.f32 %v1235_v28, %v318_v17  ;;  %v346_v42 = vmul.f32 %v1238_v3, %v317_v12 }
  0xb4   :  { %375 = vmatprep.subr.mxu0 %v345_v15  ;;  %446 = vmatprep.subr.mxu1 %v347_v37 }
  0xb5   :  { %376 = vmatpush1.msra.mxu0 %v344_v43  ;;  %447 = vmatpush1.msra.mxu1 %v346_v42 }
  0xb6   :  { %804 = vmatmul.mubr.msk.f32.vlgmr.msra.gmra.mrb[0].mxu0 %vm355_vm8, %v348_v44  ;;  %805 = vmatmul.mubr.msk.f32.vlgmr.msra.gmra.mrb[0].mxu1 %vm355_vm8, %v348_v44 }
  0xb7   :  { %707 = vmatprep.mubr.f32.mxu0 %v890_v4  ;;  %778 = vmatprep.mubr.f32.mxu1 %v890_v4 }
  0xc1   :  { %v353_v45 = vpop.permute.xlu0 %352 }
 0x189   :  { %v425_v46 = vpop.f32.mrb[0].mxu0  ;;  %v496_v49 = vpop.f32.mrb[0].mxu1 }
 0x18a   :  { %v426_v52 = vadd.f32 %v425_v46, %v353_v45  ;;  %v497_v53 = vadd.f32 %v496_v49, %v353_v45  ;;  %v427_v54 = vpop.f32.mrb[1].mxu0  ;;  %v498_v55 = vpop.f32.mrb[1].mxu1 }
 0x18b   :  { %v428_v60 = vadd.f32 %v427_v54, %v353_v45  ;;  %v499_v4 = vadd.f32 %v498_v55, %v353_v45 }
 0x18c   :  { %v1262_v56 = vmax.f32 %v426_v52, 0.0  ;;  %v1264_v57 = vmax.f32 %v497_v53, 0.0 }
 0x18d   :  { %v1270_v5 = vmax.f32 %v428_v60, 0.0  ;;  %v1276_v6 = vmax.f32 %v499_v4, 0.0 }
 0x18e   :  { %509 = vrot.lane.b32.xlu0 %v1264_v57, %s883_s25  ;;  %505 = vrot.lane.b32.xlu1 %v1262_v56, %s883_s25 }
 0x192   :  { %521 = vrot.lane.b32.xlu0 %v1262_v56, %s884_s30  ;;  %507 = vrot.lane.b32.xlu1 %v1270_v5, %s883_s25 }
 0x196   :  { %525 = vrot.lane.b32.xlu0 %v1264_v57, %s884_s30  ;;  %511 = vrot.lane.b32.xlu1 %v1276_v6, %s883_s25 }
 0x19a   :  { %537 = vrot.lane.b32.xlu0 %v1262_v56, %s885_s0  ;;  %523 = vrot.lane.b32.xlu1 %v1270_v5, %s884_s30 }
 0x19e   :  { %541 = vrot.lane.b32.xlu0 %v1264_v57, %s885_s0  ;;  %527 = vrot.lane.b32.xlu1 %v1276_v6, %s884_s30 }
 0x1a2   :  { %553 = vrot.lane.b32.xlu0 %v1262_v56, %s886_s7  ;;  %539 = vrot.lane.b32.xlu1 %v1270_v5, %s885_s0 }
 0x1a6   :  { %557 = vrot.lane.b32.xlu0 %v1264_v57, %s886_s7  ;;  %543 = vrot.lane.b32.xlu1 %v1276_v6, %s885_s0 }
 0x1aa   :  { %569 = vrot.lane.b32.xlu0 %v1262_v56, %s887_s8  ;;  %555 = vrot.lane.b32.xlu1 %v1270_v5, %s886_s7 }
 0x1ae   :  { %573 = vrot.lane.b32.xlu0 %v1264_v57, %s887_s8  ;;  %559 = vrot.lane.b32.xlu1 %v1276_v6, %s886_s7 }
 0x1b2   :  { %585 = vrot.lane.b32.xlu0 %v1262_v56, %s888_s9  ;;  %571 = vrot.lane.b32.xlu1 %v1270_v5, %s887_s8 }
 0x1b6   :  { %589 = vrot.lane.b32.xlu0 %v1264_v57, %s888_s9  ;;  %575 = vrot.lane.b32.xlu1 %v1276_v6, %s887_s8 }
 0x1ba   :  { %601 = vrot.lane.b32.xlu0 %v1262_v56, %s889_s10  ;;  %587 = vrot.lane.b32.xlu1 %v1270_v5, %s888_s9 }
 0x1be   :  { %605 = vrot.lane.b32.xlu0 %v1264_v57, %s889_s10  ;;  %591 = vrot.lane.b32.xlu1 %v1276_v6, %s888_s9 }
 0x1c2   :  { %617 = vrot.lane.b32.xlu0 %v1262_v56, %s892_s11  ;;  %603 = vrot.lane.b32.xlu1 %v1270_v5, %s889_s10 }
 0x1c6   :  { %621 = vrot.lane.b32.xlu0 %v1264_v57, %s892_s11  ;;  %607 = vrot.lane.b32.xlu1 %v1276_v6, %s889_s10 }
 0x1ca   :  { %637 = vperm.xlu0 %882, %v634_v7   ;;  %619 = vrot.lane.b32.xlu1 %v1270_v5, %s892_s11 }
 0x1ce   :  { %623 = vrot.lane.b32.xlu1 %v1276_v6, %s892_s11 }
 0x200   :  { %v510_v8 = vpop.permute.xlu0 %509  ;;  %v506_v13 = vpop.permute.xlu1 %505 }
 0x204   :  { %v522_v14 = vpop.permute.xlu0 %521  ;;  %v508_v16 = vpop.permute.xlu1 %507 }
 0x205   :  { %v515_v29 = vsel %vm37_vm0, %v506_v13, %v508_v16  ;;  %v514_v43 = vsel %vm37_vm0, %v508_v16, %v510_v8 }
 0x206   :  { %v518_v12 = vmul.f32 %v515_v29, %v1036_v20  ;;  %v519_v60 = vmul.f32 %v514_v43, %v1047_v24 }
 0x208   :  { %v526_v22 = vpop.permute.xlu0 %525  ;;  %v512_v25 = vpop.permute.xlu1 %511 }
 0x209   :  { %v513_v15 = vsel %vm37_vm0, %v510_v8, %v512_v25  ;;  %v516_v42 = vsel %vm37_vm0, %v512_v25, %v506_v13 }
 0x20a   :  { %v517_v52 = vmul.f32 %v516_v42, %v1044_v23  ;;  %v520_v53 = vmul.f32 %v513_v15, %v1060_v31 }
 0x20c   :  { %v538_v32 = vpop.permute.xlu0 %537  ;;  %v524_v34 = vpop.permute.xlu1 %523 }
 0x20d   :  { %v531_v19 = vsel %vm76_vm1, %v522_v14, %v524_v34  ;;  %v530_v17 = vsel %vm76_vm1, %v524_v34, %v526_v22 }
 0x20e   :  { %v534_v37 = vmul.f32 %v531_v19, %v1039_v21  ;;  %v535_v49 = vmul.f32 %v530_v17, %v1057_v30 }
 0x210   :  { %v542_v44 = vpop.permute.xlu0 %541  ;;  %v528_v45 = vpop.permute.xlu1 %527  ;;  %v840_v46 = vpack.c.bf16 %v534_v37, %v518_v12  ;;  %v858_v13 = vpack.c.bf16 %v535_v49, %v519_v60 }
 0x211   :  { %v529_v20 = vsel %vm76_vm1, %v526_v22, %v528_v45  ;;  %v532_v21 = vsel %vm76_vm1, %v528_v45, %v522_v14 }
 0x212   :  { %v533_v54 = vmul.f32 %v532_v21, %v1050_v27  ;;  %v536_v55 = vmul.f32 %v529_v20, %v1067_v35  ;;  %841 = vmatprep.subr.bf16.mxu0 %v840_v46 }
 0x214   :  { %v842_v4 = vpack.c.bf16 %v533_v54, %v517_v52  ;;  %v554_v7 = vpop.permute.xlu0 %553  ;;  %v540_v30 = vpop.permute.xlu1 %539  ;;  %v856_v8 = vpack.c.bf16 %v536_v55, %v520_v53 }
 0x215   :  { %v547_v23 = vsel %vm116_vm2, %v538_v32, %v540_v30  ;;  %v546_v19 = vsel %vm116_vm2, %v540_v30, %v542_v44 }
 0x216   :  { %843 = vmatpush1.bf16.msra.mxu0 %v842_v4  ;;  %857 = vmatprep.subr.bf16.mxu1 %v856_v8  ;;  %v550_v24 = vmul.f32 %v547_v23, %v1091_v58 }
 0x217   :  { %859 = vmatpush1.bf16.msra.mxu1 %v858_v13 }
 0x218   :  { %v558_v14 = vpop.permute.xlu0 %557  ;;  %v544_v16 = vpop.permute.xlu1 %543 }
 0x219   :  { %v545_v29 = vsel %vm116_vm2, %v542_v44, %v544_v16  ;;  %v548_v34 = vsel %vm116_vm2, %v544_v16, %v538_v32  ;;  %v551_v44 = vmul.f32 %v546_v19, %v1103_v62 }
 0x21a   :  { %v549_v42 = vmul.f32 %v548_v34, %v1100_v61  ;;  %v552_v43 = vmul.f32 %v545_v29, %v1106_v63 }
 0x21c   :  { %v570_v31 = vpop.permute.xlu0 %569  ;;  %v556_v27 = vpop.permute.xlu1 %555 }
 0x21d   :  { %v563_v35 = vsel %vm156_vm3, %v554_v7, %v556_v27  ;;  %v562_v22 = vsel %vm156_vm3, %v556_v27, %v558_v14 }
 0x21e   :  { %v566_v25 = vmul.f32 %v563_v35, %v1095_v59  ;;  %v567_v15 = vmul.f32 %v562_v22, %v1116_v10 }
 0x220   :  { %v574_v12 = vpop.permute.xlu0 %573  ;;  %v560_v17 = vpop.permute.xlu1 %559  ;;  %v844_v37 = vpack.c.bf16 %v566_v25, %v550_v24  ;;  %v862_v21 = vpack.c.bf16 %v567_v15, %v551_v44 }
 0x221   :  { %v561_v58 = vsel %vm156_vm3, %v558_v14, %v560_v17  ;;  %v564_v59 = vsel %vm156_vm3, %v560_v17, %v554_v7 }
 0x222   :  { %v565_v32 = vmul.f32 %v564_v59, %v1113_v9  ;;  %v568_v45 = vmul.f32 %v561_v58, %v1123_v18  ;;  %845 = vmatprep.subr.bf16.mxu0 %v844_v37 }
 0x224   :  { %v846_v46 = vpack.c.bf16 %v565_v32, %v549_v42  ;;  %v586_v49 = vpop.permute.xlu0 %585  ;;  %v572_v10 = vpop.permute.xlu1 %571  ;;  %v860_v20 = vpack.c.bf16 %v568_v45, %v552_v43 }
 0x225   :  { %v578_v52 = vsel %vm196_vm4, %v572_v10, %v574_v12  ;;  %v579_v61 = vsel %vm196_vm4, %v570_v31, %v572_v10 }
 0x226   :  { %v581_v63 = vmul.f32 %v579_v61, %v1144_v47  ;;  %v582_v9 = vmul.f32 %v578_v52, %v1152_v50  ;;  %847 = vmatpush1.bf16.msra.mxu0 %v846_v46  ;;  %861 = vmatprep.subr.bf16.mxu1 %v860_v20 }
 0x227   :  { %863 = vmatpush1.bf16.msra.mxu1 %v862_v21 }
 0x228   :  { %v850_v62 = vpack.c.bf16 %v581_v63, %v1262_v56  ;;  %v590_v18 = vpop.permute.xlu0 %589  ;;  %v576_v53 = vpop.permute.xlu1 %575  ;;  %v848_v54 = vpack.c.bf16 %v582_v9, %v1270_v5 }
 0x229   :  { %v577_v55 = vsel %vm196_vm4, %v574_v12, %v576_v53  ;;  %v580_v60 = vsel %vm196_vm4, %v576_v53, %v570_v31 }
 0x22a   :  { %v583_v4 = vmul.f32 %v577_v55, %v1155_v51  ;;  %v584_v47 = vmul.f32 %v580_v60, %v1147_v48  ;;  %849 = vmatprep.subr.bf16.mxu0 %v848_v54 }
 0x22b   :  { %851 = vmatpush1.bf16.msra.mxu0 %v850_v62 }
 0x22c   :  { %v866_v50 = vpack.c.bf16 %v583_v4, %v1264_v57  ;;  %v602_v7 = vpop.permute.xlu0 %601  ;;  %v588_v56 = vpop.permute.xlu1 %587  ;;  %v864_v30 = vpack.c.bf16 %v584_v47, %v1276_v6 }
 0x22d   :  { %v594_v13 = vsel %vm236_vm6, %v588_v56, %v590_v18  ;;  %v595_v51 = vsel %vm236_vm6, %v586_v49, %v588_v56 }
 0x22e   :  { %865 = vmatprep.subr.bf16.mxu1 %v864_v30  ;;  %v597_v16 = vmul.f32 %v595_v51, %v1207_v41  ;;  %v598_v6 = vmul.f32 %v594_v13, %v1183_v1 }
 0x22f   :  { %867 = vmatpush1.bf16.msra.mxu1 %v866_v50 }
 0x230   :  { %v606_v5 = vpop.permute.xlu0 %605  ;;  %v592_v8 = vpop.permute.xlu1 %591 }
 0x231   :  { %v593_v35 = vsel %vm236_vm6, %v590_v18, %v592_v8  ;;  %v596_v24 = vsel %vm236_vm6, %v592_v8, %v586_v49 }
 0x232   :  { %v599_v41 = vmul.f32 %v593_v35, %v1188_v33 }
 0x234   :  { %v604_v14 = vpop.permute.xlu1 %603  ;;  %v618_v23 = vpop.permute.xlu0 %617 }
 0x235   :  { %v610_v48 = vsel %vm276_vm5, %v604_v14, %v606_v5  ;;  %v611_v57 = vsel %vm276_vm5, %v602_v7, %v604_v14 }
 0x236   :  { %v613_v31 = vmul.f32 %v611_v57, %v1193_v36  ;;  %v614_v27 = vmul.f32 %v610_v48, %v1201_v39  ;;  %v600_v36 = vmul.f32 %v596_v24, %v1180_v0 }
 0x238   :  { %v854_v22 = vpack.c.bf16 %v613_v31, %v597_v16  ;;  %v608_v25 = vpop.permute.xlu1 %607  ;;  %v852_v29 = vpack.c.bf16 %v614_v27, %v598_v6  ;;  %v622_v12 = vpop.permute.xlu0 %621 }
 0x239   :  { %v609_v34 = vsel %vm276_vm5, %v606_v5, %v608_v25  ;;  %v612_v1 = vsel %vm276_vm5, %v608_v25, %v602_v7 }
 0x23a   :  { %v615_v39 = vmul.f32 %v609_v34, %v1204_v40  ;;  %v616_v19 = vmul.f32 %v612_v1, %v1198_v38  ;;  %853 = vmatprep.subr.bf16.mxu0 %v852_v29  ;;  %v633_v38 = vld [vmem:[%s1459_s3] sm:$0xff] }
 0x23b   :  { %855 = vmatpush1.bf16.msra.mxu0 %v854_v22 }
 0x23c   :  { %v870_v17 = vpack.c.bf16 %v615_v39, %v599_v41  ;;  %v620_v37 = vpop.permute.xlu1 %619  ;;  %v868_v15 = vpack.c.bf16 %v616_v19, %v600_v36 }
 0x23d   :  { %v626_v58 = vsel %vm316_vm7, %v620_v37, %v622_v12  ;;  %v627_v59 = vsel %vm316_vm7, %v618_v23, %v620_v37 }
 0x23e   :  { %v629_v33 = vmul.f32 %v627_v59, %v1241_v2  ;;  %v630_v0 = vmul.f32 %v626_v58, %v1235_v28  ;;  %869 = vmatprep.subr.bf16.mxu1 %v868_v15 }
 0x23f   :  { %871 = vmatpush1.bf16.msra.mxu1 %v870_v17 }
 0x240   :  { %659 = vmatprep.subr.mxu0 %v630_v0  ;;  %v624_v40 = vpop.permute.xlu1 %623 }
 0x241   :  { %v625_v42 = vsel %vm316_vm7, %v622_v12, %v624_v40  ;;  %v628_v43 = vsel %vm316_vm7, %v624_v40, %v618_v23  ;;  %660 = vmatpush1.msra.mxu0 %v629_v33 }
 0x242   :  { %v631_v32 = vmul.f32 %v625_v42, %v1238_v3  ;;  %v632_v2 = vmul.f32 %v628_v43, %v1232_v26  ;;  %806 = vmatmul.mubr.msk.f32.vlgmr.msra.gmra.mrb[2].mxu0 %vm355_vm8, %v633_v38 }
 0x244   :  { %730 = vmatprep.subr.mxu1 %v632_v2 }
 0x245   :  { %731 = vmatpush1.msra.mxu1 %v631_v32 }
 0x246   :  { %807 = vmatmul.mubr.msk.f32.vlgmr.msra.gmra.mrb[2].mxu1 %vm355_vm8, %v633_v38 }
 0x249   :  { %v638_v28 = vpop.permute.xlu0 %637 }
 0x315   :  { %v709_v45 = vpop.f32.mrb[2].mxu0 }
 0x316   :  { %v710_v44 = vadd.f32 %v709_v45, %v638_v28  ;;  %v711_v46 = vpop.f32.mrb[3].mxu0 }
 0x317   :  { %v712_v49 = vadd.f32 %v711_v46, %v638_v28 }
 0x318   :  { %v785_v10 = vmax.f32 %v710_v44, 0.0 }
 0x319   :  { %v786_v20 = vmax.f32 %v712_v49, 0.0  ;;  %v780_v11 = vpop.f32.mrb[2].mxu1 }
 0x31a   :  { %789 = vst [vmem:[%s1460_s6] sm:$0xff] %v785_v10  ;;  %v781_v3 = vadd.f32 %v780_v11, %v638_v28  ;;  %v782_v26 = vpop.f32.mrb[3].mxu1 }
 0x31b   :  { %790 = vst [vmem:[%s1460_s6 + $0x8] sm:$0xff] %v786_v20  ;;  %v783_v21 = vadd.f32 %v782_v26, %v638_v28 }
 0x31c   :  { %v787_v52 = vmax.f32 %v781_v3, 0.0 }
 0x31d   :  { %v788_v61 = vmax.f32 %v783_v21, 0.0 }
 0x31e   :  { %791 = vst [vmem:[%s1460_s6 + $0x10] sm:$0xff] %v787_v52 }
 0x31f   :  { %792 = vst [vmem:[%s1460_s6 + $0x18] sm:$0xff] %v788_v61 }

</bundles_post_ra>
